<compile_context>
chip_gen: v7x
topology: tpu7x:2x2x1
jax: 0.10.0
libtpu: 0.0.40
codegen_flags: <defaults>
</compile_context>

<pallas_src>
import math
from enum import Enum

import jax
import jax.numpy as jnp
from jax.experimental import pallas as pl
from jax.experimental.pallas import tpu as pltpu


class Method(Enum):
    PerTensor = 0
    PerChannel = 1


_LANES_PT = 1024       # per-tensor flattened lane width (multiple of 128)
_MAX_ROW_TILE = 256    # sublane tile (multiple of 8)
_MAX_COL_TILE = 2048   # per-channel lane tile (multiple of 128)


def _cdiv(a, b):
    return (a + b - 1) // b


def _round_up(a, b):
    return _cdiv(a, b) * b


# ----------------------------- Pallas kernels ------------------------------ #
def _fq_per_tensor_kernel(scale_ref, x_ref, o_ref):
    """Elementwise fake-quant with a single SMEM scalar scale.

    scale_ref: (1, 1) f32 in SMEM
    x_ref/o_ref: (TR, LANES) tile in VMEM
    """
    s = scale_ref[0, 0]                              # SMEM scalar -> vreg splat
    x = x_ref[...].astype(jnp.float32)
    q = jnp.clip(jnp.round(x / s), -127.0, 127.0)    # round-half-to-even, like torch.round
    o_ref[...] = (q * s).astype(o_ref.dtype)


def _fq_per_channel_kernel(scale_ref, x_ref, o_ref):
    """Elementwise fake-quant with a per-row (= per-channel) scale.

    scale_ref: (TR, 1) f32 in VMEM (broadcasts along the lane dim)
    x_ref/o_ref: (TR, TC) tile in VMEM
    """
    s = scale_ref[...].astype(jnp.float32)
    x = x_ref[...].astype(jnp.float32)
    q = jnp.clip(jnp.round(x / s), -127.0, 127.0)
    o_ref[...] = (q * s).astype(o_ref.dtype)


# ----------------------------- Python wrappers ----------------------------- #
def _fake_quant_per_tensor(x, scale):
    orig_shape = x.shape
    n = x.size
    lanes = _LANES_PT

    # Lane-dense re-layout: (rows, 1024), padded with zeros (quantize to zero,
    # sliced away afterwards).
    rows = _cdiv(n, lanes)
    flat = x.reshape(-1)
    pad = rows * lanes - n
    if pad:
        flat = jnp.pad(flat, (0, pad))
    x2d = flat.reshape(rows, lanes)

    tr = min(_MAX_ROW_TILE, rows)
    grid = (_cdiv(rows, tr),)
    s11 = jnp.asarray(scale, dtype=jnp.float32).reshape(1, 1)
    itemsize = jnp.dtype(x.dtype).itemsize

    out2d = pl.pallas_call(
        _fq_per_tensor_kernel,
        out_shape=jax.ShapeDtypeStruct((rows, lanes), x.dtype),
        grid=grid,
        in_specs=[
            pl.BlockSpec(memory_space=pltpu.MemorySpace.SMEM),   # whole (1,1) scale in SMEM
            pl.BlockSpec((tr, lanes), lambda i: (i, 0)),
        ],
        out_specs=pl.BlockSpec((tr, lanes), lambda i: (i, 0)),
        input_output_aliases={1: 0},
        cost_estimate=pl.CostEstimate(
            flops=5 * rows * lanes,
            transcendentals=0,
            bytes_accessed=2 * rows * lanes * itemsize,
        ),
        compiler_params=pltpu.CompilerParams(
            dimension_semantics=("parallel",)),
    )(s11, x2d)

    if pad:
        return out2d.reshape(-1)[:n].reshape(orig_shape)
    return out2d.reshape(orig_shape)


def _fake_quant_per_channel(x, scale):
    # Channel axis is 0, matching the module (fake_quantize_per_channel_affine(..., axis=0)).
    orig_shape = x.shape
    c = x.shape[0]
    cols = math.prod(x.shape[1:]) if x.ndim > 1 else 1

    cols_p = _round_up(cols, 128)                    # lane-aligned column count
    x2d = x.reshape(c, cols)
    if cols_p != cols:
        x2d = jnp.pad(x2d, ((0, 0), (0, cols_p - cols)))
    s2d = jnp.asarray(scale, dtype=jnp.float32).reshape(c, 1)

    tr = min(_MAX_ROW_TILE, c)
    tc = min(_MAX_COL_TILE, cols_p)
    grid = (_cdiv(c, tr), _cdiv(cols_p, tc))
    itemsize = jnp.dtype(x.dtype).itemsize

    out2d = pl.pallas_call(
        _fq_per_channel_kernel,
        out_shape=jax.ShapeDtypeStruct((c, cols_p), x.dtype),
        grid=grid,
        in_specs=[
            # scale block index only depends on the row grid axis -> not
            # re-fetched for every column tile.
            pl.BlockSpec((tr, 1), lambda i, j: (i, 0)),
            pl.BlockSpec((tr, tc), lambda i, j: (i, j)),
        ],
        out_specs=pl.BlockSpec((tr, tc), lambda i, j: (i, j)),
        input_output_aliases={1: 0},
        cost_estimate=pl.CostEstimate(
            flops=5 * c * cols_p,
            transcendentals=0,
            bytes_accessed=2 * c * cols_p * itemsize,
        ),
        compiler_params=pltpu.CompilerParams(
            dimension_semantics=("parallel", "parallel")),
    )(s2d, x2d)

    if cols_p != cols:
        out2d = out2d[:, :cols]
    return out2d.reshape(orig_shape)


def quantizer_forward(x, scale, method: Method,
                      do_collect=False, do_quant=False, do_export=False):
    """JAX/Pallas equivalent of Quantizer.forward.

    x:      array of any rank >= 1 (channel axis for PerChannel is 0, as in the module).
    scale:  scalar (PerTensor) or shape broadcastable to (x.shape[0],) (PerChannel).
            Assumed > 0 (the module clamps it to >= 1e-7 in post_compute).
    """
    assert sum([do_collect, do_quant, do_export]) <= 1, "Invalid configuration"

    if do_collect:
        # Calibration statistics collection is a host-side side effect; x passes through.
        return x
    if do_export:
        # TODO(synk): export path (affine fake-quant with zero-point, [-128,127]) not kernelized.
        return x
    if not do_quant:
        return x

    if method == Method.PerTensor:
        return _fake_quant_per_tensor(x, scale)
    return _fake_quant_per_channel(x, scale)


# ------------------------------ Reference ---------------------------------- #
def _fake_quant_ref(x, scale):
    scale = jnp.asarray(scale, dtype=jnp.float32)
    # mimic PyTorch broadcasting of a [C,1,1,1] / scalar scale against x
    while scale.ndim < x.ndim:
        scale = scale[..., None]
    return (jnp.clip(jnp.round(x / scale), -127.0, 127.0) * scale).astype(x.dtype)


# --------------------------------- Main ------------------------------------ #
if __name__ == "__main__":
    key = jax.random.PRNGKey(0)
    x = jax.random.normal(key, (2, 4, 16, 16), dtype=jnp.float32)  # NCHW

    # Deterministic "calibrator.post_compute" stand-ins (abs-max / 127, clamp 1e-7).
    scale_pt = jnp.maximum(jnp.max(jnp.abs(x)) / 127.0, 1e-7)                  # PerTensor scalar
    scale_pc = jnp.maximum(jnp.max(jnp.abs(x), axis=(1, 2, 3)) / 127.0, 1e-7)  # PerChannel (axis 0)

    # PerTensor do_quant
    out_pt = quantizer_forward(x, scale_pt, Method.PerTensor, do_quant=True)
    out_pt = jax.block_until_ready(out_pt)
    ref_pt = _fake_quant_ref(x, scale_pt)
    assert out_pt.shape == x.shape
    assert jnp.allclose(out_pt, ref_pt, atol=1e-6, rtol=1e-6), "PerTensor mismatch"

    # PerChannel do_quant
    out_pc = quantizer_forward(x, scale_pc, Method.PerChannel, do_quant=True)
    out_pc = jax.block_until_ready(out_pc)
    ref_pc = _fake_quant_ref(x, scale_pc)
    assert out_pc.shape == x.shape
    assert jnp.allclose(out_pc, ref_pc, atol=1e-6, rtol=1e-6), "PerChannel mismatch"

    # Pass-through (no mode enabled)
    out_id = jax.block_until_ready(quantizer_forward(x, scale_pt, Method.PerTensor))
    assert jnp.array_equal(out_id, x), "Identity path mismatch"

    print("KERNEL_OK")
</pallas_src>

<mosaic_0001>
module attributes {stable_mosaic.version = 11 : i64} {
  func.func @_fq_per_tensor_kernel(%arg0: i32, %arg1: memref<1x1xf32, #tpu.memory_space<smem>>, %arg2: memref<2x1024xf32, #tpu.memory_space<vmem>>, %arg3: memref<2x1024xf32, #tpu.memory_space<vmem>>) attributes {dimension_semantics = [#tpu.dimension_semantics<parallel>], iteration_bounds = array<i64: 1>, scalar_prefetch = 0 : i64, scratch_operands = 0 : i64, tpu.core_type = #tpu.core_type<tc>, window_params = [{transform_indices = @transform_0, window_bounds = array<i64: 1, 1>}, {transform_indices = @transform_1, window_bounds = array<i64: 2, 1024>}, {transform_indices = @transform_2, window_bounds = array<i64: 2, 1024>}]} {
    %c0 = arith.constant 0 : index
    %c0_0 = arith.constant 0 : index
    %0 = memref.load %arg1[%c0, %c0_0] : memref<1x1xf32, #tpu.memory_space<smem>>
    %c0_1 = arith.constant 0 : index
    %c0_2 = arith.constant 0 : index
    %1 = vector.load %arg2[%c0_1, %c0_2] : memref<2x1024xf32, #tpu.memory_space<vmem>>, vector<2x1024xf32>
    %2 = vector.broadcast %0 : f32 to vector<2x1024xf32>
    %3 = arith.divf %1, %2 : vector<2x1024xf32>
    %4 = math.roundeven %3 : vector<2x1024xf32>
    %cst = arith.constant -1.270000e+02 : f32
    %cst_3 = arith.constant 1.270000e+02 : f32
    %5 = vector.broadcast %cst : f32 to vector<2x1024xf32>
    %6 = arith.maximumf %5, %4 : vector<2x1024xf32>
    %7 = vector.broadcast %cst_3 : f32 to vector<2x1024xf32>
    %8 = arith.minimumf %7, %6 : vector<2x1024xf32>
    %9 = vector.broadcast %0 : f32 to vector<2x1024xf32>
    %10 = arith.mulf %8, %9 : vector<2x1024xf32>
    %c0_4 = arith.constant 0 : index
    %c0_5 = arith.constant 0 : index
    %11 = vector.load %arg3[%c0_4, %c0_5] : memref<2x1024xf32, #tpu.memory_space<vmem>>, vector<2x1024xf32>
    tpu.vector_store %arg3[%c0_4, %c0_5], %10 {strides = array<i32>} : memref<2x1024xf32, #tpu.memory_space<vmem>>, vector<2x1024xf32>,
    return
  }
  func.func @transform_0(%arg0: i32) -> (i32, i32) {
    %c0_i32 = arith.constant 0 : i32
    %c0_i32_0 = arith.constant 0 : i32
    %c0_i32_1 = arith.constant 0 : i32
    return %c0_i32, %c0_i32_0 : i32, i32
  }
  func.func @transform_1(%arg0: i32) -> (i32, i32) {
    %c0_i32 = arith.constant 0 : i32
    %c0_i32_0 = arith.constant 0 : i32
    return %arg0, %c0_i32 : i32, i32
  }
  func.func @transform_2(%arg0: i32) -> (i32, i32) {
    %c0_i32 = arith.constant 0 : i32
    %c0_i32_0 = arith.constant 0 : i32
    return %arg0, %c0_i32 : i32, i32
  }
}

</mosaic_0001>

<bundles_post_ra>
// kernel: tpu_custom_call.1
= control target key start
LH: loop header
LB: loop body
LE: loop exit
PB: predicated region body
PF: predicated region fallthrough
CT: control target
= control target key end

     0   :  { %8 = vsyncpa [#allocation4], 0  ;;  %s157_s0 = inlined_call_operand.<no memory space> [shape: f32[1,1], index: 0, kind: input, shape index: {}]   ;;  %s158_s1 = inlined_call_operand.hbm [shape: f32[2,1024], index: 1, kind: input, shape index: {}, may-alias: {1,2}]   ;;  %s159_s2 = inlined_call_operand.hbm [shape: f32[2,1024], index: 2, kind: output, shape index: {}, may-alias: {1,2}]  }
   0x1   :  { %9 = vsyncpa [#allocation5], 0  ;;  %s113_s9 = smov [#allocation3]   ;;  %s65_s13 = scalar_lea.hbm %s158_s1, 256 }
   0x2   :  { %s18_s10 = sshll.u32 %s113_s9, 4  ;;  %p66_p0 = scmp.ne.s32.totalorder %s158_s1, %s65_s13  ;;  %s19_s10 = int_to_ptr.vmem [resolvable:$true] %s18_s10 }
   0x3   :  { %p69_p1 = scmp.lt.u32.totalorder %s65_s13, %s158_s1 }
   0x5   :  { %p71_p2 = pnand %p69_p1, %p66_p0 }
   0x7   :  { %74 = shalt.err (!%p71_p2)
}
   0x8   :  { %s75_s18 = scalar_lea.vmem %s19_s10, 256  ;;  %p80_p4 = scmp.lt.s32.totalorder %s19_s10, %s19_s10 }
   0x9   :  { %p76_p3 = scmp.ne.s32.totalorder %s19_s10, %s75_s18  ;;  %p81_p5 = scmp.lt.s32.totalorder %s75_s18, %s75_s18 }
   0xb   :  { %p82_p6 = por %p81_p5, %p80_p4 }
   0xd   :  { %p83_p7 = pnand %p82_p6, %p76_p3 }
   0xf   :  { %86 = shalt.err (!%p83_p7)
}
  0x10   :  { %21 = dma.hbm_to_vmem [thread:$0]  %s158_s1, 256, %s19_s10, [#allocation4]  }
  0x11   :  { %109 = dma.done.wait [#allocation4], 256  }
  0x12   :  { %110 = vsyncadd [#allocation4], 4294967040  ;;  %v28_v0 = vstv %s157_s0  ;;  %v26_v1 = vld [vmem:[#allocation3] sm:$0xff]  ;;  %v27_v2 = vld [vmem:[#allocation3 + $0x8] sm:$0xff]  ;;  %s114_s23 = smov [#allocation6]  }
  0x13   :  { %63 = vrcp.f32 %v28_v0  ;;  %s48_s24 = sshll.u32 %s114_s23, 4  ;;  %s49_s24 = int_to_ptr.vmem [resolvable:$true] %s48_s24 }
  0x14   :  { %s87_s1 = scalar_lea.vmem %s49_s24, 256  ;;  %p92_p9 = scmp.lt.s32.totalorder %s49_s24, %s49_s24 }
  0x15   :  { %p88_p8 = scmp.ne.s32.totalorder %s49_s24, %s87_s1  ;;  %p93_p10 = scmp.lt.s32.totalorder %s87_s1, %s87_s1 }
  0x17   :  { %p94_p11 = por %p93_p10, %p92_p9 }
  0x19   :  { %p95_p12 = pnand %p94_p11, %p88_p8 }
  0x1d   :  { %v64_v3 = vpop.eup %63 }
  0x1e   :  { %v30_v4 = vmul.f32 %v64_v3, %v26_v1  ;;  %v31_v5 = vmul.f32 %v64_v3, %v27_v2 }
  0x20   :  { %v59_v6 = vround.rtne.f32 %v30_v4  ;;  %v60_v7 = vround.rtne.f32 %v31_v5 }
  0x22   :  { %v57_v8 = vclamps-f32 %v59_v6, 127.0  ;;  %v58_v9 = vclamps-f32 %v60_v7, 127.0 }
  0x24   :  { %v38_v10 = vmul.f32 %v57_v8, %v28_v0  ;;  %v39_v11 = vmul.f32 %v58_v9, %v28_v0 }
  0x26   :  { %40 = vst [vmem:[#allocation6] sm:$0xff] %v38_v10  ;;  %41 = vst [vmem:[#allocation6 + $0x8] sm:$0xff] %v39_v11 }
  0x27   :  { %98 = shalt.err (!%p95_p12)
}
  0x28   :  { %s99_s26 = scalar_lea.hbm %s159_s2, 256 }
  0x29   :  { %p100_p13 = scmp.ne.s32.totalorder %s159_s2, %s99_s26  ;;  %p103_p0 = scmp.lt.u32.totalorder %s99_s26, %s159_s2 }
  0x2b   :  { %p105_p1 = pnand %p103_p0, %p100_p13 }
  0x2d   :  { %108 = shalt.err (!%p105_p1)
}
  0x2e   :  { %51 = dma.vmem_to_hbm [thread:$0]  %s49_s24, 256, %s159_s2, [#allocation5]  }
  0x2f   :  { %111 = dma.done.wait [#allocation5], 256  }
  0x30   :  { %112 = vsyncadd [#allocation5], 4294967040 }
  0x31   :  { %55 = vsyncpa [#allocation4], 1 }
  0x32   :  { %56 = vsyncpa [#allocation5], 1 }

</bundles_post_ra>
